<compile_context>
chip_gen: v5e
topology: v5e:2x2
jax: 0.10.0
libtpu: 0.0.40
codegen_flags: <defaults>
</compile_context>

<pallas_src>
import functools

import jax
import jax.numpy as jnp
from jax.experimental import pallas as pl
from jax.experimental.pallas import tpu as pltpu


# Tap order (dh, dw) is row-major over (kh, kw), matching the weight reshape.
_TAPS = tuple((dh, dw) for dh in (-1, 0, 1) for dw in (-1, 0, 1))


# ---------------------------------------------------------------------------
# Fused forward kernel: conv3x3+ReLU, conv3x3+ReLU, GAP, Linear+ReLU, Linear
# ---------------------------------------------------------------------------
def _fused_forward_kernel(x_ref, m_ref, w1_ref, b1_ref, w2_ref, b2_ref,
                          fw1_ref, fb1_ref, fw2_ref, fb2_ref, o_ref,
                          stk1_ref, stk2_ref, *, H, W, bt):
    HW = H * W
    N = bt * HW   # lane width of this grid step (Bt images side by side)

    # Precomputed per-pixel boundary masks (8 non-center taps), VMEM resident.
    # They are tiled per image, so rolls that cross image boundaries are zeroed.
    mrows = [m_ref[i:i + 1, :] for i in range(8)]            # each (1, N) f32

    def conv3x3_relu(inp, w_ref_, b_ref_, stk_ref):
        # inp: (Cin, N) channel-major f32; w_ref_: (Cout, 9*Cin); b_ref_: (Cout, 1)
        # All 9 shifted/masked taps are stacked along sublanes in VMEM scratch and
        # contracted with ONE MXU matmul (K = 9*Cin) instead of 9 tiny matmuls.
        cin = inp.shape[0]
        mi = 0
        for t, (dh, dw) in enumerate(_TAPS):
            s = dh * W + dw                                  # flat spatial shift
            if s == 0:
                tap = inp                                    # center tap: no shift
            else:
                tap = pltpu.roll(inp, shift=(-s) % N, axis=1) * mrows[mi]
                mi += 1
            stk_ref[t * cin:(t + 1) * cin, :] = tap
        stacked = stk_ref[...].astype(w_ref_.dtype)          # (9*Cin, N) bf16/f32
        acc = jnp.dot(w_ref_[...], stacked,
                      preferred_element_type=jnp.float32)    # (Cout, N) f32
        return jnp.maximum(acc + b_ref_[...], 0.0)

    x = x_ref[...].astype(jnp.float32)                       # (Cin, N)
    a1 = conv3x3_relu(x, w1_ref, b1_ref, stk1_ref)           # (C1, N)
    a2 = conv3x3_relu(a1, w2_ref, b2_ref, stk2_ref)          # (C2, N)

    # Global average pool per image BEFORE fc1 (mean(W@a) == W@mean(a)).
    cols = [jnp.mean(a2[:, i * HW:(i + 1) * HW], axis=1, keepdims=True)
            for i in range(bt)]
    pooled = cols[0] if bt == 1 else jnp.concatenate(cols, axis=1)   # (C2, bt)

    h = jnp.maximum(jnp.dot(fw1_ref[...], pooled,
                            preferred_element_type=jnp.float32)
                    + fb1_ref[...], 0.0)                      # (hidden, bt)
    logits = jnp.dot(fw2_ref[...], h,
                     preferred_element_type=jnp.float32) + fb2_ref[...]  # (ncls, bt)
    o_ref[0] = logits.astype(o_ref.dtype)


# ---------------------------------------------------------------------------
# Parameters (PyTorch layouts) + one-time reordering for the kernel
# ---------------------------------------------------------------------------
def init_params(key, c_in=4, c1=16, c2=32, hidden=32, num_classes=8):
    ks = jax.random.split(key, 8)
    s = 0.1
    return {
        "conv1_w": s * jax.random.normal(ks[0], (c1, c_in, 3, 3), jnp.float32),  # OIHW
        "conv1_b": s * jax.random.normal(ks[1], (c1,), jnp.float32),
        "conv2_w": s * jax.random.normal(ks[2], (c2, c1, 3, 3), jnp.float32),
        "conv2_b": s * jax.random.normal(ks[3], (c2,), jnp.float32),
        "fc1_w":   s * jax.random.normal(ks[4], (hidden, c2), jnp.float32),       # (out, in)
        "fc1_b":   s * jax.random.normal(ks[5], (hidden,), jnp.float32),
        "fc2_w":   s * jax.random.normal(ks[6], (num_classes, hidden), jnp.float32),
        "fc2_b":   s * jax.random.normal(ks[7], (num_classes,), jnp.float32),
    }


def _prep_kernel_params(params, compute_dtype):
    """Reorder PyTorch-layout weights for the channel-major fused kernel."""
    def conv_flat(w):   # (Cout, Cin, 3, 3) -> (Cout, 9*Cin); K index = tap*Cin + cin
        cout, cin = w.shape[0], w.shape[1]
        return jnp.transpose(w, (0, 2, 3, 1)).reshape(cout, 9 * cin)

    return (
        conv_flat(params["conv1_w"]).astype(compute_dtype),   # (C1, 9*Cin)
        params["conv1_b"].reshape(-1, 1).astype(jnp.float32),
        conv_flat(params["conv2_w"]).astype(compute_dtype),   # (C2, 9*C1)
        params["conv2_b"].reshape(-1, 1).astype(jnp.float32),
        params["fc1_w"].astype(jnp.float32),                  # (hidden, C2)
        params["fc1_b"].reshape(-1, 1).astype(jnp.float32),   # (hidden, 1)
        params["fc2_w"].astype(jnp.float32),                  # (ncls, hidden)
        params["fc2_b"].reshape(-1, 1).astype(jnp.float32),   # (ncls, 1)
    )


def _boundary_masks(H, W, bt):
    """(8, bt*H*W) f32 masks for the 8 non-center taps (per-image 'same' padding)."""
    hw = H * W
    r = jnp.arange(hw, dtype=jnp.int32)
    h_idx = r // W
    w_idx = r % W
    rows = []
    for dh, dw in _TAPS:
        if dh == 0 and dw == 0:
            continue
        rows.append((h_idx + dh >= 0) & (h_idx + dh < H) &
                    (w_idx + dw >= 0) & (w_idx + dw < W))
    masks = jnp.stack(rows).astype(jnp.float32)               # (8, HW)
    return jnp.tile(masks, (1, bt))                           # (8, bt*HW)


def _choose_batch_tile(B, HW, max_lanes=4096):
    """Largest divisor Bt of B with Bt*HW <= max_lanes and >= 2 grid steps."""
    if HW % 128 != 0:
        return B          # fall back to a full-batch slab (block == full lane dim)
    best = 1
    for cand in range(1, B + 1):
        if B % cand or cand * HW > max_lanes:
            continue
        if B // cand >= 2 or B == 1:
            best = cand
    return best


# ---------------------------------------------------------------------------
# Forward wrapper (mirrors OneDomainModel.forward / .predict)
# ---------------------------------------------------------------------------
def one_domain_model_forward(params, input_nchw, compute_dtype=jnp.bfloat16):
    B, Cin, H, W = input_nchw.shape
    HW = H * W
    bt = _choose_batch_tile(B, HW)
    nsteps = B // bt
    n_lanes = bt * HW

    w1, b1, w2, b2, fw1, fb1, fw2, fb2 = _prep_kernel_params(params, compute_dtype)
    C1, C2 = w1.shape[0], w2.shape[0]
    hidden, ncls = fw1.shape[0], fw2.shape[0]

    # Channel-major batched lane slab: (Cin, B*HW), image-major along lanes.
    x_cm = (input_nchw.astype(jnp.float32)
            .reshape(B, Cin, HW)
            .transpose(1, 0, 2)
            .reshape(Cin, B * HW))

    masks = _boundary_masks(H, W, bt)                          # (8, bt*HW)

    kernel = functools.partial(_fused_forward_kernel, H=H, W=W, bt=bt)

    flops = 2 * B * (HW * 9 * (Cin * C1 + C1 * C2) + C2 * hidden + hidden * ncls)
    item_w = jnp.dtype(compute_dtype).itemsize
    bytes_accessed = int(4 * (x_cm.size + masks.size + b1.size + b2.size
                              + fw1.size + fb1.size + fw2.size + fb2.size
                              + B * ncls)
                         + item_w * (w1.size + w2.size))

    # Honest VMEM bound derived from block/scratch sizes (with headroom).
    f32b = 4
    scratch_bytes = (9 * Cin + 9 * C1) * n_lanes * f32b
    act_bytes = n_lanes * f32b * (2 * Cin + 8 + C1 + C2) + 9 * C1 * n_lanes * item_w
    wgt_bytes = item_w * (w1.size + w2.size) + f32b * (fw1.size + fw2.size + b1.size
                                                       + b2.size + fb1.size + fb2.size)
    vmem_limit = int(min(64 << 20,
                         max(4 << 20, 3 * (scratch_bytes + act_bytes + wgt_bytes))))

    out = pl.pallas_call(
        kernel,
        out_shape=jax.ShapeDtypeStruct((nsteps, ncls, bt), jnp.float32),
        grid_spec=pltpu.PrefetchScalarGridSpec(
            num_scalar_prefetch=0,
            grid=(nsteps,),
            in_specs=[
                pl.BlockSpec((Cin, n_lanes), lambda b: (0, b)),    # input slab
                pl.BlockSpec((8, n_lanes), lambda b: (0, 0)),      # boundary masks
                pl.BlockSpec((C1, 9 * Cin), lambda b: (0, 0)),     # conv1 weight (taps flat)
                pl.BlockSpec((C1, 1), lambda b: (0, 0)),           # conv1 bias
                pl.BlockSpec((C2, 9 * C1), lambda b: (0, 0)),      # conv2 weight
                pl.BlockSpec((C2, 1), lambda b: (0, 0)),           # conv2 bias
                pl.BlockSpec((hidden, C2), lambda b: (0, 0)),      # fc1 weight
                pl.BlockSpec((hidden, 1), lambda b: (0, 0)),       # fc1 bias
                pl.BlockSpec((ncls, hidden), lambda b: (0, 0)),    # fc2 weight
                pl.BlockSpec((ncls, 1), lambda b: (0, 0)),         # fc2 bias
            ],
            out_specs=pl.BlockSpec((1, ncls, bt), lambda b: (b, 0, 0)),
            scratch_shapes=[
                pltpu.VMEM((9 * Cin, n_lanes), jnp.float32),       # conv1 tap stack
                pltpu.VMEM((9 * C1, n_lanes), jnp.float32),        # conv2 tap stack
            ],
        ),
        compiler_params=pltpu.CompilerParams(
            dimension_semantics=("parallel",),      # v7x: steps split across 2 TCs
            vmem_limit_bytes=vmem_limit,
        ),
        cost_estimate=pl.CostEstimate(
            flops=flops, transcendentals=0, bytes_accessed=bytes_accessed),
    )(x_cm, masks, w1, b1, w2, b2, fw1, fb1, fw2, fb2)

    logits = jnp.transpose(out, (0, 2, 1)).reshape(B, ncls)
    return {"class": logits}


def predict(params, input_nchw):
    return one_domain_model_forward(params, input_nchw)["class"]


# ---------------------------------------------------------------------------
# Pure-JAX reference (HIGHEST precision) for a runtime sanity check
# ---------------------------------------------------------------------------
def reference_forward(params, input_nchw):
    hi = jax.lax.Precision.HIGHEST
    y = input_nchw.astype(jnp.float32)
    for wn, bn in (("conv1_w", "conv1_b"), ("conv2_w", "conv2_b")):
        y = jax.lax.conv_general_dilated(
            y, params[wn], window_strides=(1, 1), padding=((1, 1), (1, 1)),
            dimension_numbers=("NCHW", "OIHW", "NCHW"), precision=hi)
        y = jnp.maximum(y + params[bn][None, :, None, None], 0.0)
    feat = jnp.mean(y, axis=(2, 3))                                   # (B, C2)
    h = jnp.maximum(jnp.dot(feat, params["fc1_w"].T, precision=hi)
                    + params["fc1_b"], 0.0)
    return jnp.dot(h, params["fc2_w"].T, precision=hi) + params["fc2_b"]


# ---------------------------------------------------------------------------
if __name__ == "__main__":
    key = jax.random.PRNGKey(0)
    pkey, xkey = jax.random.split(key)

    params = init_params(pkey)

    # batch=2, channels=4, spatial=16x16 (NCHW, like the PyTorch module input)
    x = jax.random.normal(xkey, (2, 4, 16, 16), jnp.float32)

    out = jax.jit(one_domain_model_forward)(params, x)
    logits = jax.block_until_ready(out["class"])
    assert logits.shape == (2, 8)
    assert bool(jnp.all(jnp.isfinite(logits)))

    ref = jax.block_until_ready(reference_forward(params, x))
    max_err = float(jnp.max(jnp.abs(logits - ref)))
    # Tolerance reflects bf16 MXU operands (f32 accumulation) vs HIGHEST-precision
    # reference; structural bugs produce errors orders of magnitude above this.
    assert jnp.allclose(logits, ref, rtol=1e-2, atol=1e-2), max_err

    print("KERNEL_OK")
</pallas_src>

<mosaic_0001>
module attributes {stable_mosaic.version = 11 : i64} {
  func.func @_fused_forward_kernel(%arg0: i32, %arg1: memref<4x256xf32, #tpu.memory_space<vmem>>, %arg2: memref<8x256xf32, #tpu.memory_space<vmem>>, %arg3: memref<16x36xbf16, #tpu.memory_space<vmem>>, %arg4: memref<16x1xf32, #tpu.memory_space<vmem>>, %arg5: memref<32x144xbf16, #tpu.memory_space<vmem>>, %arg6: memref<32x1xf32, #tpu.memory_space<vmem>>, %arg7: memref<32x32xf32, #tpu.memory_space<vmem>>, %arg8: memref<32x1xf32, #tpu.memory_space<vmem>>, %arg9: memref<8x32xf32, #tpu.memory_space<vmem>>, %arg10: memref<8x1xf32, #tpu.memory_space<vmem>>, %arg11: memref<1x8x1xf32, #tpu.memory_space<vmem>>, %arg12: memref<36x256xf32, #tpu.memory_space<vmem>>, %arg13: memref<144x256xf32, #tpu.memory_space<vmem>>) attributes {dimension_semantics = [#tpu.dimension_semantics<parallel>], iteration_bounds = array<i64: 2>, scalar_prefetch = 0 : i64, scratch_operands = 2 : i64, tpu.core_type = #tpu.core_type<tc>, window_params = [{transform_indices = @transform_0, window_bounds = array<i64: 4, 256>}, {pipeline_mode = #tpu.pipeline_mode<synchronous>, transform_indices = @transform_1, window_bounds = array<i64: 8, 256>}, {pipeline_mode = #tpu.pipeline_mode<synchronous>, transform_indices = @transform_2, window_bounds = array<i64: 16, 36>}, {pipeline_mode = #tpu.pipeline_mode<synchronous>, transform_indices = @transform_3, window_bounds = array<i64: 16, 1>}, {pipeline_mode = #tpu.pipeline_mode<synchronous>, transform_indices = @transform_4, window_bounds = array<i64: 32, 144>}, {pipeline_mode = #tpu.pipeline_mode<synchronous>, transform_indices = @transform_5, window_bounds = array<i64: 32, 1>}, {pipeline_mode = #tpu.pipeline_mode<synchronous>, transform_indices = @transform_6, window_bounds = array<i64: 32, 32>}, {pipeline_mode = #tpu.pipeline_mode<synchronous>, transform_indices = @transform_7, window_bounds = array<i64: 32, 1>}, {pipeline_mode = #tpu.pipeline_mode<synchronous>, transform_indices = @transform_8, window_bounds = array<i64: 8, 32>}, {pipeline_mode = #tpu.pipeline_mode<synchronous>, transform_indices = @transform_9, window_bounds = array<i64: 8, 1>}, {transform_indices = @transform_10, window_bounds = array<i64: 1, 8, 1>}]} {
    %c0 = arith.constant 0 : index
    %c0_0 = arith.constant 0 : index
    %0 = vector.load %arg2[%c0, %c0_0] : memref<8x256xf32, #tpu.memory_space<vmem>>, vector<1x256xf32>
    %c1 = arith.constant 1 : index
    %c0_1 = arith.constant 0 : index
    %1 = vector.load %arg2[%c1, %c0_1] : memref<8x256xf32, #tpu.memory_space<vmem>>, vector<1x256xf32>
    %c2 = arith.constant 2 : index
    %c0_2 = arith.constant 0 : index
    %2 = vector.load %arg2[%c2, %c0_2] : memref<8x256xf32, #tpu.memory_space<vmem>>, vector<1x256xf32>
    %c3 = arith.constant 3 : index
    %c0_3 = arith.constant 0 : index
    %3 = vector.load %arg2[%c3, %c0_3] : memref<8x256xf32, #tpu.memory_space<vmem>>, vector<1x256xf32>
    %c4 = arith.constant 4 : index
    %c0_4 = arith.constant 0 : index
    %4 = vector.load %arg2[%c4, %c0_4] : memref<8x256xf32, #tpu.memory_space<vmem>>, vector<1x256xf32>
    %c5 = arith.constant 5 : index
    %c0_5 = arith.constant 0 : index
    %5 = vector.load %arg2[%c5, %c0_5] : memref<8x256xf32, #tpu.memory_space<vmem>>, vector<1x256xf32>
    %c6 = arith.constant 6 : index
    %c0_6 = arith.constant 0 : index
    %6 = vector.load %arg2[%c6, %c0_6] : memref<8x256xf32, #tpu.memory_space<vmem>>, vector<1x256xf32>
    %c7 = arith.constant 7 : index
    %c0_7 = arith.constant 0 : index
    %7 = vector.load %arg2[%c7, %c0_7] : memref<8x256xf32, #tpu.memory_space<vmem>>, vector<1x256xf32>
    %c0_8 = arith.constant 0 : index
    %c0_9 = arith.constant 0 : index
    %8 = vector.load %arg1[%c0_8, %c0_9] : memref<4x256xf32, #tpu.memory_space<vmem>>, vector<4x256xf32>
    %c17_i32 = arith.constant 17 : i32
    %9 = tpu.dynamic_rotate %8 by %c17_i32 dim 1 : vector<4x256xf32>, i32 -> vector<4x256xf32>
    %10 = vector.broadcast %0 : vector<1x256xf32> to vector<4x256xf32>
    %11 = arith.mulf %9, %10 : vector<4x256xf32>
    %c0_10 = arith.constant 0 : index
    %c0_11 = arith.constant 0 : index
    %12 = vector.load %arg12[%c0_10, %c0_11] : memref<36x256xf32, #tpu.memory_space<vmem>>, vector<4x256xf32>
    tpu.vector_store %arg12[%c0_10, %c0_11], %11 {strides = array<i32>} : memref<36x256xf32, #tpu.memory_space<vmem>>, vector<4x256xf32>,
    %c16_i32 = arith.constant 16 : i32
    %13 = tpu.dynamic_rotate %8 by %c16_i32 dim 1 : vector<4x256xf32>, i32 -> vector<4x256xf32>
    %14 = vector.broadcast %1 : vector<1x256xf32> to vector<4x256xf32>
    %15 = arith.mulf %13, %14 : vector<4x256xf32>
    %c4_12 = arith.constant 4 : index
    %c0_13 = arith.constant 0 : index
    %16 = vector.load %arg12[%c4_12, %c0_13] : memref<36x256xf32, #tpu.memory_space<vmem>>, vector<4x256xf32>
    tpu.vector_store %arg12[%c4_12, %c0_13], %15 {strides = array<i32>} : memref<36x256xf32, #tpu.memory_space<vmem>>, vector<4x256xf32>,
    %c15_i32 = arith.constant 15 : i32
    %17 = tpu.dynamic_rotate %8 by %c15_i32 dim 1 : vector<4x256xf32>, i32 -> vector<4x256xf32>
    %18 = vector.broadcast %2 : vector<1x256xf32> to vector<4x256xf32>
    %19 = arith.mulf %17, %18 : vector<4x256xf32>
    %c8 = arith.constant 8 : index
    %c0_14 = arith.constant 0 : index
    %20 = vector.load %arg12[%c8, %c0_14] : memref<36x256xf32, #tpu.memory_space<vmem>>, vector<4x256xf32>
    tpu.vector_store %arg12[%c8, %c0_14], %19 {strides = array<i32>} : memref<36x256xf32, #tpu.memory_space<vmem>>, vector<4x256xf32>,
    %c1_i32 = arith.constant 1 : i32
    %21 = tpu.dynamic_rotate %8 by %c1_i32 dim 1 : vector<4x256xf32>, i32 -> vector<4x256xf32>
    %22 = vector.broadcast %3 : vector<1x256xf32> to vector<4x256xf32>
    %23 = arith.mulf %21, %22 : vector<4x256xf32>
    %c12 = arith.constant 12 : index
    %c0_15 = arith.constant 0 : index
    %24 = vector.load %arg12[%c12, %c0_15] : memref<36x256xf32, #tpu.memory_space<vmem>>, vector<4x256xf32>
    tpu.vector_store %arg12[%c12, %c0_15], %23 {strides = array<i32>} : memref<36x256xf32, #tpu.memory_space<vmem>>, vector<4x256xf32>,
    %c16 = arith.constant 16 : index
    %c0_16 = arith.constant 0 : index
    %25 = vector.load %arg12[%c16, %c0_16] : memref<36x256xf32, #tpu.memory_space<vmem>>, vector<4x256xf32>
    tpu.vector_store %arg12[%c16, %c0_16], %8 {strides = array<i32>} : memref<36x256xf32, #tpu.memory_space<vmem>>, vector<4x256xf32>,
    %c255_i32 = arith.constant 255 : i32
    %26 = tpu.dynamic_rotate %8 by %c255_i32 dim 1 : vector<4x256xf32>, i32 -> vector<4x256xf32>
    %27 = vector.broadcast %4 : vector<1x256xf32> to vector<4x256xf32>
    %28 = arith.mulf %26, %27 : vector<4x256xf32>
    %c20 = arith.constant 20 : index
    %c0_17 = arith.constant 0 : index
    %29 = vector.load %arg12[%c20, %c0_17] : memref<36x256xf32, #tpu.memory_space<vmem>>, vector<4x256xf32>
    tpu.vector_store %arg12[%c20, %c0_17], %28 {strides = array<i32>} : memref<36x256xf32, #tpu.memory_space<vmem>>, vector<4x256xf32>,
    %c241_i32 = arith.constant 241 : i32
    %30 = tpu.dynamic_rotate %8 by %c241_i32 dim 1 : vector<4x256xf32>, i32 -> vector<4x256xf32>
    %31 = vector.broadcast %5 : vector<1x256xf32> to vector<4x256xf32>
    %32 = arith.mulf %30, %31 : vector<4x256xf32>
    %c24 = arith.constant 24 : index
    %c0_18 = arith.constant 0 : index
    %33 = vector.load %arg12[%c24, %c0_18] : memref<36x256xf32, #tpu.memory_space<vmem>>, vector<4x256xf32>
    tpu.vector_store %arg12[%c24, %c0_18], %32 {strides = array<i32>} : memref<36x256xf32, #tpu.memory_space<vmem>>, vector<4x256xf32>,
    %c240_i32 = arith.constant 240 : i32
    %34 = tpu.dynamic_rotate %8 by %c240_i32 dim 1 : vector<4x256xf32>, i32 -> vector<4x256xf32>
    %35 = vector.broadcast %6 : vector<1x256xf32> to vector<4x256xf32>
    %36 = arith.mulf %34, %35 : vector<4x256xf32>
    %c28 = arith.constant 28 : index
    %c0_19 = arith.constant 0 : index
    %37 = vector.load %arg12[%c28, %c0_19] : memref<36x256xf32, #tpu.memory_space<vmem>>, vector<4x256xf32>
    tpu.vector_store %arg12[%c28, %c0_19], %36 {strides = array<i32>} : memref<36x256xf32, #tpu.memory_space<vmem>>, vector<4x256xf32>,
    %c239_i32 = arith.constant 239 : i32
    %38 = tpu.dynamic_rotate %8 by %c239_i32 dim 1 : vector<4x256xf32>, i32 -> vector<4x256xf32>
    %39 = vector.broadcast %7 : vector<1x256xf32> to vector<4x256xf32>
    %40 = arith.mulf %38, %39 : vector<4x256xf32>
    %c32 = arith.constant 32 : index
    %c0_20 = arith.constant 0 : index
    %41 = vector.load %arg12[%c32, %c0_20] : memref<36x256xf32, #tpu.memory_space<vmem>>, vector<4x256xf32>
    tpu.vector_store %arg12[%c32, %c0_20], %40 {strides = array<i32>} : memref<36x256xf32, #tpu.memory_space<vmem>>, vector<4x256xf32>,
    %c0_21 = arith.constant 0 : index
    %c0_22 = arith.constant 0 : index
    %42 = vector.load %arg12[%c0_21, %c0_22] : memref<36x256xf32, #tpu.memory_space<vmem>>, vector<36x256xf32>
    %43 = arith.truncf %42 : vector<36x256xf32> to vector<36x256xbf16>
    %c0_23 = arith.constant 0 : index
    %c0_24 = arith.constant 0 : index
    %44 = vector.load %arg3[%c0_23, %c0_24] : memref<16x36xbf16, #tpu.memory_space<vmem>>, vector<16x36xbf16>
    %cst = arith.constant dense<0.000000e+00> : vector<16x256xf32>
    %45 = tpu.matmul %44, %43, %cst {dimension_numbers = #tpu.dot_dimension_numbers<[1], [0], [0], [1], [0, 0, 1, 1], [], []>} : vector<16x36xbf16>, vector<36x256xbf16>, vector<16x256xf32> -> vector<16x256xf32>
    %c0_25 = arith.constant 0 : index
    %c0_26 = arith.constant 0 : index
    %46 = vector.load %arg4[%c0_25, %c0_26] : memref<16x1xf32, #tpu.memory_space<vmem>>, vector<16x1xf32>
    %47 = vector.broadcast %46 : vector<16x1xf32> to vector<16x256xf32>
    %48 = arith.addf %45, %47 : vector<16x256xf32>
    %cst_27 = arith.constant 0.000000e+00 : f32
    %49 = vector.broadcast %cst_27 : f32 to vector<16x256xf32>
    %50 = arith.maximumf %48, %49 : vector<16x256xf32>
    %c17_i32_28 = arith.constant 17 : i32
    %51 = tpu.dynamic_rotate %50 by %c17_i32_28 dim 1 : vector<16x256xf32>, i32 -> vector<16x256xf32>
    %52 = vector.broadcast %0 : vector<1x256xf32> to vector<16x256xf32>
    %53 = arith.mulf %51, %52 : vector<16x256xf32>
    %c0_29 = arith.constant 0 : index
    %c0_30 = arith.constant 0 : index
    %54 = vector.load %arg13[%c0_29, %c0_30] : memref<144x256xf32, #tpu.memory_space<vmem>>, vector<16x256xf32>
    tpu.vector_store %arg13[%c0_29, %c0_30], %53 {strides = array<i32>} : memref<144x256xf32, #tpu.memory_space<vmem>>, vector<16x256xf32>,
    %c16_i32_31 = arith.constant 16 : i32
    %55 = tpu.dynamic_rotate %50 by %c16_i32_31 dim 1 : vector<16x256xf32>, i32 -> vector<16x256xf32>
    %56 = vector.broadcast %1 : vector<1x256xf32> to vector<16x256xf32>
    %57 = arith.mulf %55, %56 : vector<16x256xf32>
    %c16_32 = arith.constant 16 : index
    %c0_33 = arith.constant 0 : index
    %58 = vector.load %arg13[%c16_32, %c0_33] : memref<144x256xf32, #tpu.memory_space<vmem>>, vector<16x256xf32>
    tpu.vector_store %arg13[%c16_32, %c0_33], %57 {strides = array<i32>} : memref<144x256xf32, #tpu.memory_space<vmem>>, vector<16x256xf32>,
    %c15_i32_34 = arith.constant 15 : i32
    %59 = tpu.dynamic_rotate %50 by %c15_i32_34 dim 1 : vector<16x256xf32>, i32 -> vector<16x256xf32>
    %60 = vector.broadcast %2 : vector<1x256xf32> to vector<16x256xf32>
    %61 = arith.mulf %59, %60 : vector<16x256xf32>
    %c32_35 = arith.constant 32 : index
    %c0_36 = arith.constant 0 : index
    %62 = vector.load %arg13[%c32_35, %c0_36] : memref<144x256xf32, #tpu.memory_space<vmem>>, vector<16x256xf32>
    tpu.vector_store %arg13[%c32_35, %c0_36], %61 {strides = array<i32>} : memref<144x256xf32, #tpu.memory_space<vmem>>, vector<16x256xf32>,
    %c1_i32_37 = arith.constant 1 : i32
    %63 = tpu.dynamic_rotate %50 by %c1_i32_37 dim 1 : vector<16x256xf32>, i32 -> vector<16x256xf32>
    %64 = vector.broadcast %3 : vector<1x256xf32> to vector<16x256xf32>
    %65 = arith.mulf %63, %64 : vector<16x256xf32>
    %c48 = arith.constant 48 : index
    %c0_38 = arith.constant 0 : index
    %66 = vector.load %arg13[%c48, %c0_38] : memref<144x256xf32, #tpu.memory_space<vmem>>, vector<16x256xf32>
    tpu.vector_store %arg13[%c48, %c0_38], %65 {strides = array<i32>} : memref<144x256xf32, #tpu.memory_space<vmem>>, vector<16x256xf32>,
    %c64 = arith.constant 64 : index
    %c0_39 = arith.constant 0 : index
    %67 = vector.load %arg13[%c64, %c0_39] : memref<144x256xf32, #tpu.memory_space<vmem>>, vector<16x256xf32>
    tpu.vector_store %arg13[%c64, %c0_39], %50 {strides = array<i32>} : memref<144x256xf32, #tpu.memory_space<vmem>>, vector<16x256xf32>,
    %c255_i32_40 = arith.constant 255 : i32
    %68 = tpu.dynamic_rotate %50 by %c255_i32_40 dim 1 : vector<16x256xf32>, i32 -> vector<16x256xf32>
    %69 = vector.broadcast %4 : vector<1x256xf32> to vector<16x256xf32>
    %70 = arith.mulf %68, %69 : vector<16x256xf32>
    %c80 = arith.constant 80 : index
    %c0_41 = arith.constant 0 : index
    %71 = vector.load %arg13[%c80, %c0_41] : memref<144x256xf32, #tpu.memory_space<vmem>>, vector<16x256xf32>
    tpu.vector_store %arg13[%c80, %c0_41], %70 {strides = array<i32>} : memref<144x256xf32, #tpu.memory_space<vmem>>, vector<16x256xf32>,
    %c241_i32_42 = arith.constant 241 : i32
    %72 = tpu.dynamic_rotate %50 by %c241_i32_42 dim 1 : vector<16x256xf32>, i32 -> vector<16x256xf32>
    %73 = vector.broadcast %5 : vector<1x256xf32> to vector<16x256xf32>
    %74 = arith.mulf %72, %73 : vector<16x256xf32>
    %c96 = arith.constant 96 : index
    %c0_43 = arith.constant 0 : index
    %75 = vector.load %arg13[%c96, %c0_43] : memref<144x256xf32, #tpu.memory_space<vmem>>, vector<16x256xf32>
    tpu.vector_store %arg13[%c96, %c0_43], %74 {strides = array<i32>} : memref<144x256xf32, #tpu.memory_space<vmem>>, vector<16x256xf32>,
    %c240_i32_44 = arith.constant 240 : i32
    %76 = tpu.dynamic_rotate %50 by %c240_i32_44 dim 1 : vector<16x256xf32>, i32 -> vector<16x256xf32>
    %77 = vector.broadcast %6 : vector<1x256xf32> to vector<16x256xf32>
    %78 = arith.mulf %76, %77 : vector<16x256xf32>
    %c112 = arith.constant 112 : index
    %c0_45 = arith.constant 0 : index
    %79 = vector.load %arg13[%c112, %c0_45] : memref<144x256xf32, #tpu.memory_space<vmem>>, vector<16x256xf32>
    tpu.vector_store %arg13[%c112, %c0_45], %78 {strides = array<i32>} : memref<144x256xf32, #tpu.memory_space<vmem>>, vector<16x256xf32>,
    %c239_i32_46 = arith.constant 239 : i32
    %80 = tpu.dynamic_rotate %50 by %c239_i32_46 dim 1 : vector<16x256xf32>, i32 -> vector<16x256xf32>
    %81 = vector.broadcast %7 : vector<1x256xf32> to vector<16x256xf32>
    %82 = arith.mulf %80, %81 : vector<16x256xf32>
    %c128 = arith.constant 128 : index
    %c0_47 = arith.constant 0 : index
    %83 = vector.load %arg13[%c128, %c0_47] : memref<144x256xf32, #tpu.memory_space<vmem>>, vector<16x256xf32>
    tpu.vector_store %arg13[%c128, %c0_47], %82 {strides = array<i32>} : memref<144x256xf32, #tpu.memory_space<vmem>>, vector<16x256xf32>,
    %c0_48 = arith.constant 0 : index
    %c0_49 = arith.constant 0 : index
    %84 = vector.load %arg13[%c0_48, %c0_49] : memref<144x256xf32, #tpu.memory_space<vmem>>, vector<144x256xf32>
    %85 = arith.truncf %84 : vector<144x256xf32> to vector<144x256xbf16>
    %c0_50 = arith.constant 0 : index
    %c0_51 = arith.constant 0 : index
    %86 = vector.load %arg5[%c0_50, %c0_51] : memref<32x144xbf16, #tpu.memory_space<vmem>>, vector<32x144xbf16>
    %cst_52 = arith.constant dense<0.000000e+00> : vector<32x256xf32>
    %87 = tpu.matmul %86, %85, %cst_52 {dimension_numbers = #tpu.dot_dimension_numbers<[1], [0], [0], [1], [0, 0, 1, 1], [], []>} : vector<32x144xbf16>, vector<144x256xbf16>, vector<32x256xf32> -> vector<32x256xf32>
    %c0_53 = arith.constant 0 : index
    %c0_54 = arith.constant 0 : index
    %88 = vector.load %arg6[%c0_53, %c0_54] : memref<32x1xf32, #tpu.memory_space<vmem>>, vector<32x1xf32>
    %89 = vector.broadcast %88 : vector<32x1xf32> to vector<32x256xf32>
    %90 = arith.addf %87, %89 : vector<32x256xf32>
    %cst_55 = arith.constant 0.000000e+00 : f32
    %91 = vector.broadcast %cst_55 : f32 to vector<32x256xf32>
    %92 = arith.maximumf %90, %91 : vector<32x256xf32>
    %cst_56 = arith.constant dense<0.000000e+00> : vector<32xf32>
    %93 = vector.multi_reduction <add>, %92, %cst_56 [1] : vector<32x256xf32> to vector<32xf32>
    %94 = vector.shape_cast %93 : vector<32xf32> to vector<32x1xf32>
    %cst_57 = arith.constant 2.560000e+02 : f32
    %95 = vector.broadcast %cst_57 : f32 to vector<32x1xf32>
    %96 = arith.divf %94, %95 : vector<32x1xf32>
    %c0_58 = arith.constant 0 : index
    %c0_59 = arith.constant 0 : index
    %97 = vector.load %arg7[%c0_58, %c0_59] : memref<32x32xf32, #tpu.memory_space<vmem>>, vector<32x32xf32>
    %cst_60 = arith.constant dense<0.000000e+00> : vector<32x1xf32>
    %98 = tpu.matmul %97, %96, %cst_60 {dimension_numbers = #tpu.dot_dimension_numbers<[1], [0], [0], [1], [0, 0, 1, 1], [], []>} : vector<32x32xf32>, vector<32x1xf32>, vector<32x1xf32> -> vector<32x1xf32>
    %c0_61 = arith.constant 0 : index
    %c0_62 = arith.constant 0 : index
    %99 = vector.load %arg8[%c0_61, %c0_62] : memref<32x1xf32, #tpu.memory_space<vmem>>, vector<32x1xf32>
    %100 = arith.addf %98, %99 : vector<32x1xf32>
    %cst_63 = arith.constant 0.000000e+00 : f32
    %101 = vector.broadcast %cst_63 : f32 to vector<32x1xf32>
    %102 = arith.maximumf %100, %101 : vector<32x1xf32>
    %c0_64 = arith.constant 0 : index
    %c0_65 = arith.constant 0 : index
    %103 = vector.load %arg9[%c0_64, %c0_65] : memref<8x32xf32, #tpu.memory_space<vmem>>, vector<8x32xf32>
    %cst_66 = arith.constant dense<0.000000e+00> : vector<8x1xf32>
    %104 = tpu.matmul %103, %102, %cst_66 {dimension_numbers = #tpu.dot_dimension_numbers<[1], [0], [0], [1], [0, 0, 1, 1], [], []>} : vector<8x32xf32>, vector<32x1xf32>, vector<8x1xf32> -> vector<8x1xf32>
    %c0_67 = arith.constant 0 : index
    %c0_68 = arith.constant 0 : index
    %105 = vector.load %arg10[%c0_67, %c0_68] : memref<8x1xf32, #tpu.memory_space<vmem>>, vector<8x1xf32>
    %106 = arith.addf %104, %105 : vector<8x1xf32>
    %c0_69 = arith.constant 0 : index
    %c0_70 = arith.constant 0 : index
    %c0_71 = arith.constant 0 : index
    %107 = vector.load %arg11[%c0_69, %c0_70, %c0_71] : memref<1x8x1xf32, #tpu.memory_space<vmem>>, vector<1x8x1xf32>
    %108 = vector.shape_cast %107 : vector<1x8x1xf32> to vector<8x1xf32>
    %109 = vector.shape_cast %106 : vector<8x1xf32> to vector<1x8x1xf32>
    tpu.vector_store %arg11[%c0_69, %c0_70, %c0_71], %109 {strides = array<i32>} : memref<1x8x1xf32, #tpu.memory_space<vmem>>, vector<1x8x1xf32>,
    return
  }
  func.func @transform_0(%arg0: i32) -> (i32, i32) {
    %c0_i32 = arith.constant 0 : i32
    %c0_i32_0 = arith.constant 0 : i32
    return %c0_i32, %arg0 : i32, i32
  }
  func.func @transform_1(%arg0: i32) -> (i32, i32) {
    %c0_i32 = arith.constant 0 : i32
    %c0_i32_0 = arith.constant 0 : i32
    %c0_i32_1 = arith.constant 0 : i32
    return %c0_i32, %c0_i32_0 : i32, i32
  }
  func.func @transform_2(%arg0: i32) -> (i32, i32) {
    %c0_i32 = arith.constant 0 : i32
    %c0_i32_0 = arith.constant 0 : i32
    %c0_i32_1 = arith.constant 0 : i32
    return %c0_i32, %c0_i32_0 : i32, i32
  }
  func.func @transform_3(%arg0: i32) -> (i32, i32) {
    %c0_i32 = arith.constant 0 : i32
    %c0_i32_0 = arith.constant 0 : i32
    %c0_i32_1 = arith.constant 0 : i32
    return %c0_i32, %c0_i32_0 : i32, i32
  }
  func.func @transform_4(%arg0: i32) -> (i32, i32) {
    %c0_i32 = arith.constant 0 : i32
    %c0_i32_0 = arith.constant 0 : i32
    %c0_i32_1 = arith.constant 0 : i32
    return %c0_i32, %c0_i32_0 : i32, i32
  }
  func.func @transform_5(%arg0: i32) -> (i32, i32) {
    %c0_i32 = arith.constant 0 : i32
    %c0_i32_0 = arith.constant 0 : i32
    %c0_i32_1 = arith.constant 0 : i32
    return %c0_i32, %c0_i32_0 : i32, i32
  }
  func.func @transform_6(%arg0: i32) -> (i32, i32) {
    %c0_i32 = arith.constant 0 : i32
    %c0_i32_0 = arith.constant 0 : i32
    %c0_i32_1 = arith.constant 0 : i32
    return %c0_i32, %c0_i32_0 : i32, i32
  }
  func.func @transform_7(%arg0: i32) -> (i32, i32) {
    %c0_i32 = arith.constant 0 : i32
    %c0_i32_0 = arith.constant 0 : i32
    %c0_i32_1 = arith.constant 0 : i32
    return %c0_i32, %c0_i32_0 : i32, i32
  }
  func.func @transform_8(%arg0: i32) -> (i32, i32) {
    %c0_i32 = arith.constant 0 : i32
    %c0_i32_0 = arith.constant 0 : i32
    %c0_i32_1 = arith.constant 0 : i32
    return %c0_i32, %c0_i32_0 : i32, i32
  }
  func.func @transform_9(%arg0: i32) -> (i32, i32) {
    %c0_i32 = arith.constant 0 : i32
    %c0_i32_0 = arith.constant 0 : i32
    %c0_i32_1 = arith.constant 0 : i32
    return %c0_i32, %c0_i32_0 : i32, i32
  }
  func.func @transform_10(%arg0: i32) -> (i32, i32, i32) {
    %c0_i32 = arith.constant 0 : i32
    %c0_i32_0 = arith.constant 0 : i32
    %c0_i32_1 = arith.constant 0 : i32
    return %arg0, %c0_i32, %c0_i32_0 : i32, i32, i32
  }
}

</mosaic_0001>

<bundles_post_ra>
// kernel: one_domain_model_forward.1
= control target key start
LH: loop header
LB: loop body
LE: loop exit
PB: predicated region body
PF: predicated region fallthrough
CT: control target
= control target key end

     0   :  { %s1318_s13 = smov 0   ;;  %s1754_s0 = inlined_call_operand.vmem [shape: f32[4,512], index: 0, kind: input, shape index: {}]   ;;  %s1755_s1 = inlined_call_operand.vmem [shape: f32[8,256], index: 1, kind: input, shape index: {}]   ;;  %s1756_s2 = inlined_call_operand.vmem [shape: bf16[16,36], index: 2, kind: input, shape index: {}]   ;;  %s1757_s3 = inlined_call_operand.vmem [shape: f32[16,1], index: 3, kind: input, shape index: {}]   ;;  %s1758_s4 = inlined_call_operand.vmem [shape: bf16[32,144], index: 4, kind: input, shape index: {}]   ;;  %s1759_s5 = inlined_call_operand.vmem [shape: f32[32,1], index: 5, kind: input, shape index: {}]   ;;  %s1760_s6 = inlined_call_operand.vmem [shape: f32[32,32], index: 6, kind: input, shape index: {}]   ;;  %s1761_s7 = inlined_call_operand.vmem [shape: f32[32,1], index: 7, kind: input, shape index: {}]   ;;  %s1762_s8 = inlined_call_operand.vmem [shape: f32[8,32], index: 8, kind: input, shape index: {}]   ;;  %s1763_s9 = inlined_call_operand.vmem [shape: f32[8,1], index: 9, kind: input, shape index: {}]   ;;  %s1764_s10 = inlined_call_operand.vmem [shape: f32[2,8,1], index: 10, kind: output, shape index: {}]  }
   0x1 LB: > { %s1324_s14 = sadd.s32 4294967295, %s1251_s13   ;;  %p1173_p0 = scmp.ge.s32.totalorder %s1251_s13, 1  ;;  %s1251_s13 = sphi %s1318_s13, %s20_s13  }
   0x2   : > { %p313_p1 = scmp.lt.s32.totalorder %s1251_s13, 3 }
   0x4   : > { %p314_p2 = pnand %p1173_p0, %p313_p1 }
   0x5   : > { %s1174_s15 = sshll.u32 (!%p314_p2), %s1324_s14, 1  ;;  %s1253_s20 = smov (!%p314_p2), 16  }
   0x6   : > { %317 = sbr.rel (%p314_p2) target bundleno = 1156 (0x484), region = 60  ;;  %p351_p3 = scmp.lt.s32.totalorder (!%p314_p2), %s1174_s15, 3 }
   0x7   : > { %s1254_s21 = smov (!%p314_p2), 1   ;;  %s1255_s22 = smov (!%p314_p2), 127  }
   0x8   : > { %s1256_s23 = smov (!%p314_p2), 113   ;;  %s1257_s24 = smov (!%p314_p2), 112  }
   0x9   : > { %s1258_s25 = smov (!%p314_p2), 111   ;;  %s1259_s26 = smov (!%p314_p2), 17  }
   0xa   : > { %s1260_s27 = smov (!%p314_p2), 15   ;;  %p356_p4 = scmp.lt.s32.totalorder (!%p314_p2), %s1324_s14, 1 }
   0xb   : > { %s1766_s15 = smov (!%p351_p3, %s1174_s15), 3  ;;  %v387_v19 = vlaneseq  ;;  %v1177_v22 = vld [vmem:[%s1755_s1 + $0x1] ss:$8 sm:$0x3]  ;;  %vm618_vm7 = vcmask 1041408   ;;  %vm614_vm9 = vcmask 293888  }
   0xc   : > { %s1175_s16 = sshll.u32 %s1766_s15, 2  ;;  %v1354_v24 = vperm.slane %v1177_v22, 0  ;;  %v1356_v25 = vperm.slane %v1177_v22, 1  ;;  %v1179_v32 = vld [vmem:[%s1755_s1 + $0x3] ss:$8 sm:$0x3] }
   0xd   : > { %s354_s19 = scalar_lea.vmem %s1754_s0, %s1175_s16  ;;  %v1348_v20 = vand.u32 127, %v387_v19  ;;  %v1368_v33 = vperm.slane %v1179_v32, 0  ;;  %v1370_v34 = vperm.slane %v1179_v32, 1  ;;  %v1182_v44 = vld [vmem:[%s1755_s1 + $0x6] ss:$8 sm:$0x3] }
   0xe   : > { %v376_v0 = vld [vmem:[%s354_s19] sm:$0xff]  ;;  %v1382_v45 = vperm.slane %v1182_v44, 0  ;;  %v1384_v46 = vperm.slane %v1182_v44, 1  ;;  %vm921_vm10 = vcmask 130048   ;;  %vm1043_vm12 = vcmask 261120   ;;  %s1768_s14 = smov (!%p356_p4, %s1324_s14), 1 }
   0xf   : > { %378 = vst [vmem:[#allocation1] ss:$2 sm:$0xff] %v376_v0  ;;  %vm410_vm0 = vcmp.lt.s32.totalorder %v1348_v20, 16  ;;  %vm458_vm1 = vcmp.lt.s32.totalorder %v1348_v20, 1  ;;  %vm540_vm2 = vcmp.lt.s32.totalorder %v1348_v20, 112  ;;  %vm492_vm3 = vcmp.lt.s32.totalorder %v1348_v20, 127 }
  0x10   : > { %v1180_v53 = vld [vmem:[%s1755_s1 + $0x4] ss:$8 sm:$0x3]  ;;  %v1181_v63 = vld [vmem:[%s1755_s1 + $0x5] ss:$8 sm:$0x3] }
  0x11   : > { %v1396_v56 = vperm.slane %v1180_v53, 0  ;;  %v1398_v57 = vperm.slane %v1180_v53, 1  ;;  %vm519_vm4 = vcmp.lt.s32.totalorder %v1348_v20, 113  ;;  %vm567_vm5 = vcmp.lt.s32.totalorder %v1348_v20, 111  ;;  %v597_v19 = vld [vmem:[%s1757_s3] sm:$0xff] }
  0x12   : > { %v361_v22 = vld [vmem:[%s1755_s1] ss:$8 sm:$0x3]  ;;  %vm389_vm6 = vcmp.lt.s32.totalorder %v1348_v20, 17  ;;  %vm437_vm8 = vcmp.lt.s32.totalorder %v1348_v20, 15  ;;  %vm1114_vm13 = vcmask 7168  }
  0x16   : > { %v379_v1 = vld.sshfl [vmem:[#allocation1] sm:$0xff pattern:$0x75316420]  ;;  %v380_v2 = vld.sshfl [vmem:[#allocation1 + $0x8] sm:$0xff pattern:$0x75316420] }
  0x17   : > { %401 = vst [vmem:[#allocation1] ss:$2 sm:$0xff] %v376_v0 }
  0x1e   : > { %v402_v3 = vld.sshfl [vmem:[#allocation1] sm:$0xff pattern:$0x75316420]  ;;  %v403_v4 = vld.sshfl [vmem:[#allocation1 + $0x8] sm:$0xff pattern:$0x75316420] }
  0x1f   : > { %428 = vst [vmem:[#allocation1] ss:$2 sm:$0xff] %v376_v0  ;;  %408 = vrot.lane.b32.xlu0 %v403_v4, %s1253_s20  ;;  %406 = vrot.lane.b32.xlu2 %v402_v3, %s1253_s20  ;;  %v1412_v3 = vperm.slane %v1181_v63, 1 }
  0x26   : > { %v429_v5 = vld.sshfl [vmem:[#allocation1] sm:$0xff pattern:$0x75316420]  ;;  %v430_v6 = vld.sshfl [vmem:[#allocation1 + $0x8] sm:$0xff pattern:$0x75316420] }
  0x27   : > { %449 = vst [vmem:[#allocation1] ss:$2 sm:$0xff] %v376_v0 }
  0x2e   : > { %v450_v7 = vld.sshfl [vmem:[#allocation1] sm:$0xff pattern:$0x75316420]  ;;  %v451_v8 = vld.sshfl [vmem:[#allocation1 + $0x8] sm:$0xff pattern:$0x75316420] }
  0x2f   : > { %454 = vrot.lane.b32.xlu1 %v450_v7, %s1254_s21  ;;  %476 = vst [vmem:[#allocation1] ss:$2 sm:$0xff] %v376_v0  ;;  %456 = vrot.lane.b32.xlu2 %v451_v8, %s1254_s21 }
  0x36   : > { %v477_v9 = vld.sshfl [vmem:[#allocation1] sm:$0xff pattern:$0x75316420]  ;;  %v478_v10 = vld.sshfl [vmem:[#allocation1 + $0x8] sm:$0xff pattern:$0x75316420] }
  0x37   : > { %481 = vst [vmem:[#allocation2 + $0x48] sm:$0xf] %v477_v9 }
  0x38   : > { %482 = vst [vmem:[#allocation2 + $0x28] sm:$0xf] %v478_v10 }
  0x39   : > { %483 = vst [vmem:[#allocation1] ss:$2 sm:$0xff] %v376_v0 }
  0x40   : > { %v484_v11 = vld.sshfl [vmem:[#allocation1] sm:$0xff pattern:$0x75316420]  ;;  %v485_v12 = vld.sshfl [vmem:[#allocation1 + $0x8] sm:$0xff pattern:$0x75316420] }
  0x41   : > { %488 = vrot.lane.b32.xlu1 %v484_v11, %s1255_s22  ;;  %510 = vst [vmem:[#allocation1] ss:$2 sm:$0xff] %v376_v0  ;;  %v1183_v11 = vld [vmem:[%s1755_s1 + $0x7] ss:$8 sm:$0x3] }
  0x48   : > { %v512_v13 = vld.sshfl [vmem:[#allocation1 + $0x8] sm:$0xff pattern:$0x75316420]  ;;  %v511_v14 = vld.sshfl [vmem:[#allocation1] sm:$0xff pattern:$0x75316420] }
  0x49   : > { %490 = vrot.lane.b32.xlu1 %v485_v12, %s1255_s22  ;;  %515 = vrot.lane.b32.xlu0 %v511_v14, %s1256_s23  ;;  %531 = vst [vmem:[#allocation1] ss:$2 sm:$0xff] %v376_v0  ;;  %v1424_v12 = vperm.slane %v1183_v11, 0 }
  0x50   : > { %v532_v15 = vld.sshfl [vmem:[#allocation1] sm:$0xff pattern:$0x75316420]  ;;  %v533_v16 = vld.sshfl [vmem:[#allocation1 + $0x8] sm:$0xff pattern:$0x75316420] }
  0x51   : > { %517 = vrot.lane.b32.xlu1 %v512_v13, %s1256_s23  ;;  %558 = vst [vmem:[#allocation1] ss:$2 sm:$0xff] %v376_v0  ;;  %536 = vrot.lane.b32.xlu2 %v532_v15, %s1257_s24  ;;  %v1426_v13 = vperm.slane %v1183_v11, 1 }
  0x58   : > { %v559_v17 = vld.sshfl [vmem:[#allocation1] sm:$0xff pattern:$0x75316420]  ;;  %v560_v18 = vld.sshfl [vmem:[#allocation1 + $0x8] sm:$0xff pattern:$0x75316420] }
  0x59   : > { %563 = vrot.lane.b32.xlu0 %v559_v17, %s1258_s25  ;;  %538 = vrot.lane.b32.xlu2 %v533_v16, %s1257_s24 }
  0x5a   : > { %385 = vrot.lane.b32.xlu1 %v380_v2, %s1259_s26  ;;  %v1410_v2 = vperm.slane %v1181_v63, 0 }
  0x61   : > { %565 = vrot.lane.b32.xlu0 %v560_v18, %s1258_s25  ;;  %433 = vrot.lane.b32.xlu2 %v429_v5, %s1260_s27 }
  0x69   : > { %383 = vrot.lane.b32.xlu0 %v379_v1, %s1259_s26 }
  0x71   : > { %435 = vrot.lane.b32.xlu0 %v430_v6, %s1260_s27 }
  0x79   : > { %v407_v21 = vpop.permute.xlu2 %406 }
  0x89   : > { %v457_v36 = vpop.permute.xlu2 %456 }
  0x91   : > { %v409_v23 = vpop.permute.xlu0 %408 }
  0x92   : > { %v411_v26 = vsel %vm410_vm0, %v407_v21, %v409_v23  ;;  %v412_v27 = vsel %vm410_vm0, %v409_v23, %v407_v21  ;;  %v598_v21 = vld [vmem:[%s1757_s3 + $0x8] sm:$0xff]  ;;  %v1261_v23 = vmov 0  }
  0x93   : > { %v418_v28 = vmul.f32 %v1354_v24, %v412_v27  ;;  %v419_v29 = vmul.f32 %v1356_v25, %v411_v26  ;;  %1240 = vset.pattern.permute.xlu1 %v1261_v23  ;;  %1241 = vset.pattern.permute.xlu2 %v1261_v23  ;;  %v1444_v27 = vperm.slane %v361_v22, 0 }
  0x94   : > { %601 = vperm.xlu1 %1240, %v597_v19   ;;  %606 = vperm.xlu2 %1241, %v598_v21  }
  0x95   : > { %v422_v30 = vrot.slane %v418_v28, 4  ;;  %v423_v31 = vrot.slane %v419_v29, 4  ;;  %1242 = vset.pattern.permute.xlu0 %v1261_v23  ;;  %v1446_v28 = vperm.slane %v361_v22, 1  ;;  %v882_v23 = vld [vmem:[%s1759_s5 + $0x18] sm:$0xff] }
  0x97   : > { %426 = vst [vmem:[#allocation2 + $0x30] sm:$0xf0] %v422_v30 }
  0x98   : > { %427 = vst [vmem:[#allocation2] sm:$0xf0] %v423_v31 }
  0xa1   : > { %v455_v35 = vpop.permute.xlu1 %454 }
  0xa2   : > { %v459_v37 = vsel %vm458_vm1, %v455_v35, %v457_v36  ;;  %v460_v38 = vsel %vm458_vm1, %v457_v36, %v455_v35 }
  0xa3   : > { %v466_v39 = vmul.f32 %v1368_v33, %v460_v38  ;;  %v467_v40 = vmul.f32 %v1370_v34, %v459_v37  ;;  %v1178_v37 = vld [vmem:[%s1755_s1 + $0x2] ss:$8 sm:$0x3] }
  0xa4   : > { %v1460_v44 = vperm.slane %v1178_v37, 1 }
  0xa5   : > { %v470_v41 = vrot.slane %v466_v39, 4  ;;  %v471_v42 = vrot.slane %v467_v40, 4 }
  0xa7   : > { %474 = vst [vmem:[#allocation2 + $0x18] sm:$0xf0] %v470_v41 }
  0xa8   : > { %475 = vst [vmem:[#allocation2 + $0x10] sm:$0xf0] %v471_v42 }
  0xab   : > { %v537_v43 = vpop.permute.xlu2 %536 }
  0xb3   : > { %v489_v47 = vpop.permute.xlu1 %488  ;;  %v539_v48 = vpop.permute.xlu2 %538 }
  0xb4   : > { %v541_v49 = vsel %vm540_vm2, %v537_v43, %v539_v48  ;;  %v542_v50 = vsel %vm540_vm2, %v539_v48, %v537_v43  ;;  %v1458_v43 = vperm.slane %v1178_v37, 0 }
  0xb5   : > { %v548_v51 = vmul.f32 %v1382_v45, %v541_v49  ;;  %v549_v52 = vmul.f32 %v1384_v46, %v542_v50 }
  0xb7   : > { %v552_v54 = vrot.slane %v548_v51, 4  ;;  %v553_v55 = vrot.slane %v549_v52, 4 }
  0xb9   : > { %556 = vst [vmem:[#allocation2 + $0x8] sm:$0xf0] %v552_v54 }
  0xba   : > { %557 = vst [vmem:[#allocation2 + $0x20] sm:$0xf0] %v553_v55 }
  0xbb   : > { %v491_v58 = vpop.permute.xlu1 %490  ;;  %v516_v4 = vpop.permute.xlu0 %515 }
  0xbc   : > { %v493_v59 = vsel %vm492_vm3, %v489_v47, %v491_v58  ;;  %v494_v60 = vsel %vm492_vm3, %v491_v58, %v489_v47  ;;  %v434_v42 = vpop.permute.xlu2 %433 }
  0xbd   : > { %v500_v61 = vmul.f32 %v1396_v56, %v493_v59  ;;  %v501_v62 = vmul.f32 %v1398_v57, %v494_v60 }
  0xbf   : > { %v504_v0 = vrot.slane %v500_v61, 4  ;;  %v505_v1 = vrot.slane %v501_v62, 4 }
  0xc1   : > { %508 = vst [vmem:[#allocation2 + $0x48] sm:$0xf0] %v504_v0 }
  0xc2   : > { %509 = vst [vmem:[#allocation2 + $0x28] sm:$0xf0] %v505_v1 }
  0xc3   : > { %v518_v5 = vpop.permute.xlu1 %517 }
  0xc4   : > { %v520_v6 = vsel %vm519_vm4, %v516_v4, %v518_v5  ;;  %v521_v7 = vsel %vm519_vm4, %v518_v5, %v516_v4  ;;  %v1217_v5 = vld [vmem:[%s1756_s2] sm:$0xff] }
  0xc5   : > { %v527_v8 = vmul.f32 %v1410_v2, %v520_v6  ;;  %v528_v9 = vmul.f32 %v1412_v3, %v521_v7 }
  0xc7   : > { %529 = vst [vmem:[#allocation2 + $0x8] sm:$0xf] %v527_v8 }
  0xc8   : > { %530 = vst [vmem:[#allocation2 + $0x20] sm:$0xf] %v528_v9  ;;  %v583_v47 = vld [vmem:[#allocation2 + $0x48] sm:$0xff] }
  0xc9   : > { %v584_v50 = vld [vmem:[#allocation2 + $0x28] sm:$0xff] }
  0xcb   : > { %v564_v10 = vpop.permute.xlu0 %563 }
  0xcc   : > { %v386_v26 = vpop.permute.xlu1 %385 }
  0xce   : > { %v585_v48 = vld [vmem:[#allocation2 + $0x8] sm:$0xff] }
  0xcf   : > { %v586_v51 = vld [vmem:[#allocation2 + $0x20] sm:$0xff]  ;;  %v591_v55 = vpack.c.bf16 %v585_v48, %v583_v47 }
  0xd0   : > { %v592_v60 = vpack.c.bf16 %v586_v51, %v584_v50 }
  0xd3   : > { %v566_v14 = vpop.permute.xlu0 %565 }
  0xd4   : > { %v568_v15 = vsel %vm567_vm5, %v564_v10, %v566_v14  ;;  %v569_v16 = vsel %vm567_vm5, %v566_v14, %v564_v10 }
  0xd5   : > { %v575_v17 = vmul.f32 %v1424_v12, %v568_v15  ;;  %v576_v18 = vmul.f32 %v1426_v13, %v569_v16 }
  0xd7   : > { %577 = vst [vmem:[#allocation2 + $0x40] sm:$0xf] %v575_v17 }
  0xd8   : > { %578 = vst [vmem:[#allocation2 + $0x38] sm:$0xf] %v576_v18 }
  0xdb   : > { %v384_v29 = vpop.permute.xlu0 %383 }
  0xdc   : > { %v390_v30 = vsel %vm389_vm6, %v384_v29, %v386_v26  ;;  %v391_v31 = vsel %vm389_vm6, %v386_v26, %v384_v29  ;;  %v880_v26 = vld [vmem:[%s1759_s5 + $0x8] sm:$0xff]  ;;  %v879_v29 = vld [vmem:[%s1759_s5] sm:$0xff] }
  0xdd   : > { %v397_v32 = vmul.f32 %v1444_v27, %v391_v31  ;;  %v398_v35 = vmul.f32 %v1446_v28, %v390_v30 }
  0xde   : > { %v587_v36 = vld [vmem:[#allocation2 + $0x40] sm:$0xf] }
  0xdf   : > { %399 = vst [vmem:[#allocation2 + $0x30] sm:$0xf] %v397_v32  ;;  %v593_v38 = vpack.c.bf16 %v587_v36, %v587_v36  ;;  %v588_v39 = vld [vmem:[#allocation2 + $0x38] sm:$0xf] }
  0xe0   : > { %400 = vst [vmem:[#allocation2] sm:$0xf] %v398_v35  ;;  %v594_v40 = vpack.c.bf16 %v588_v39, %v588_v39 }
  0xe1   : > { %v620_v41 = vsel %vm618_vm7, %v593_v38, 0 }
  0xe2   : > { %630 = vmatpush.bf16.msra.mxu0 %v620_v41  ;;  %v623_v49 = vsel %vm618_vm7, %v594_v40, 0 }
  0xe3   : > { %644 = vmatpush.bf16.msra.mxu1 %v623_v49  ;;  %v436_v52 = vpop.permute.xlu0 %435 }
  0xe4   : > { %v438_v53 = vsel %vm437_vm8, %v434_v42, %v436_v52  ;;  %v439_v54 = vsel %vm437_vm8, %v436_v52, %v434_v42 }
  0xe5   : > { %v445_v58 = vmul.f32 %v1458_v43, %v439_v54  ;;  %v446_v59 = vmul.f32 %v1460_v44, %v438_v53 }
  0xe6   : > { %631 = vmatpush.bf16.msra.mxu0 %v591_v55  ;;  %v579_v61 = vld [vmem:[#allocation2 + $0x30] sm:$0xff] }
  0xe7   : > { %447 = vst [vmem:[#allocation2 + $0x18] sm:$0xf] %v445_v58  ;;  %645 = vmatpush.bf16.msra.mxu1 %v592_v60  ;;  %v580_v0 = vld [vmem:[#allocation2] sm:$0xff] }
  0xe8   : > { %448 = vst [vmem:[#allocation2 + $0x10] sm:$0xf] %v446_v59 }
  0xee   : > { %v581_v62 = vld [vmem:[#allocation2 + $0x18] sm:$0xff]  ;;  %v607_v15 = vpop.permute.xlu2 %606 }
  0xef   : > { %v589_v63 = vpack.c.bf16 %v581_v62, %v579_v61  ;;  %v582_v1 = vld [vmem:[#allocation2 + $0x10] sm:$0xff] }
  0xf0   : > { %v590_v4 = vpack.c.bf16 %v582_v1, %v580_v0  ;;  %v1218_v0 = vld [vmem:[%s1758_s4 + $0x4] sm:$0xf]  ;;  %v1194_v1 = vld [vmem:[%s1758_s4 + $0x8] sm:$0xf0] }
  0xf1   : > { %632 = vmatpush.bf16.msra.mxu0 %v589_v63 }
  0xf2   : > { %646 = vmatpush.bf16.msra.mxu1 %v590_v4 }
  0xf4   : > { %1188 = vmatmul.msk.bf16.vlgmr.msra.gmra.mxu0 %vm614_vm9, %v1217_v5 }
  0xf5   : > { %1189 = vmatmul.msk.bf16.vlgmr.msra.gmra.mxu1 %vm614_vm9, %v1217_v5 }
 0x106   : > { %v602_v6 = vpop.permute.xlu1 %601 }
 0x171   : > { %v634_v7 = vpop.f32.mrf.mxu0 }
 0x172   : > { %v635_v8 = vadd.f32 %v634_v7, %v602_v6  ;;  %v648_v9 = vpop.f32.mrf.mxu1  ;;  %v1197_v7 = vor.u32 %v1218_v0, %v1194_v1 }
 0x173   : > { %v649_v10 = vadd.f32 %v648_v9, %v602_v6 }
 0x174   : > { %v1471_v11 = vmax.f32 %v635_v8, 0.0 }
 0x175   : > { %v1473_v14 = vmax.f32 %v649_v10, 0.0 }
 0x176   : > { %781 = vrot.lane.b32.xlu1 %v1471_v11, %s1257_s24  ;;  %801 = vrot.lane.b32.xlu0 %v1471_v11, %s1258_s25 }
 0x177   : > { %805 = vrot.lane.b32.xlu2 %v1473_v14, %s1258_s25 }
 0x179   : > { %v636_v16 = vpop.f32.mrf.mxu0 }
 0x17a   : > { %v650_v17 = vpop.f32.mrf.mxu1  ;;  %v637_v18 = vadd.f32 %v636_v16, %v607_v15 }
 0x17b   : > { %v651_v19 = vadd.f32 %v650_v17, %v607_v15 }
 0x17c   : > { %v1505_v21 = vmax.f32 %v637_v18, 0.0 }
 0x17d   : > { %v1507_v22 = vmax.f32 %v651_v19, 0.0 }
 0x17e   : > { %765 = vrot.lane.b32.xlu1 %v1473_v14, %s1256_s23  ;;  %785 = vrot.lane.b32.xlu0 %v1473_v14, %s1257_s24 }
 0x17f   : > { %761 = vrot.lane.b32.xlu2 %v1471_v11, %s1256_s23 }
 0x186   : > { %717 = vrot.lane.b32.xlu1 %v1471_v11, %s1254_s21  ;;  %741 = vrot.lane.b32.xlu0 %v1471_v11, %s1255_s22 }
 0x187   : > { %745 = vrot.lane.b32.xlu2 %v1473_v14, %s1255_s22 }
 0x18e   : > { %701 = vrot.lane.b32.xlu1 %v1473_v14, %s1260_s27  ;;  %721 = vrot.lane.b32.xlu0 %v1473_v14, %s1254_s21 }
 0x18f   : > { %697 = vrot.lane.b32.xlu2 %v1471_v11, %s1260_s27 }
 0x196   : > { %657 = vrot.lane.b32.xlu1 %v1471_v11, %s1259_s26  ;;  %677 = vrot.lane.b32.xlu0 %v1471_v11, %s1253_s20 }
 0x197   : > { %681 = vrot.lane.b32.xlu2 %v1473_v14, %s1253_s20 }
 0x19e   : > { %803 = vrot.lane.b32.xlu1 %v1505_v21, %s1258_s25  ;;  %807 = vrot.lane.b32.xlu0 %v1507_v22, %s1258_s25 }
 0x19f   : > { %783 = vrot.lane.b32.xlu2 %v1505_v21, %s1257_s24 }
 0x1a6   : > { %787 = vrot.lane.b32.xlu1 %v1507_v22, %s1257_s24  ;;  %763 = vrot.lane.b32.xlu0 %v1505_v21, %s1256_s23 }
 0x1a7   : > { %767 = vrot.lane.b32.xlu2 %v1507_v22, %s1256_s23 }
 0x1ae   : > { %743 = vrot.lane.b32.xlu1 %v1505_v21, %s1255_s22  ;;  %747 = vrot.lane.b32.xlu0 %v1507_v22, %s1255_s22 }
 0x1af   : > { %719 = vrot.lane.b32.xlu2 %v1505_v21, %s1254_s21 }
 0x1b6   : > { %723 = vrot.lane.b32.xlu1 %v1507_v22, %s1254_s21  ;;  %699 = vrot.lane.b32.xlu0 %v1505_v21, %s1260_s27 }
 0x1b7   : > { %703 = vrot.lane.b32.xlu2 %v1507_v22, %s1260_s27 }
 0x1be   : > { %679 = vrot.lane.b32.xlu1 %v1505_v21, %s1253_s20  ;;  %683 = vrot.lane.b32.xlu0 %v1507_v22, %s1253_s20 }
 0x1bf   : > { %659 = vrot.lane.b32.xlu2 %v1505_v21, %s1259_s26 }
 0x1c6   : > { %663 = vrot.lane.b32.xlu1 %v1507_v22, %s1259_s26  ;;  %661 = vrot.lane.b32.xlu0 %v1473_v14, %s1259_s26  ;;  %s1176_s26 = sshll.u32 %s1768_s14, 3 }
 0x1c7   : > { %900 = vperm.xlu2 %1241, %v882_v23   ;;  %s359_s15 = scalar_lea.vmem %s1764_s10, %s1176_s26 }
 0x1ce   : > { %890 = vperm.xlu1 %1240, %v880_v26  }
 0x1cf   : > { %885 = vperm.xlu2 %1241, %v879_v29  }
 0x1d1   : > { %v806_v30 = vpop.permute.xlu2 %805 }
 0x1d9   : > { %v762_v31 = vpop.permute.xlu2 %761 }
 0x1e1   : > { %v746_v36 = vpop.permute.xlu2 %745 }
 0x1e8   : > { %v782_v32 = vpop.permute.xlu1 %781  ;;  %v802_v35 = vpop.permute.xlu0 %801 }
 0x1e9   : > { %v1552_v39 = vpop.permute.xlu2 %697  ;;  %v809_v52 = vsel %vm567_vm5, %v802_v35, %v806_v30  ;;  %v811_v53 = vsel %vm567_vm5, %v806_v30, %v802_v35 }
 0x1ea   : > { %v814_v60 = vmul.f32 %v811_v53, %v1426_v13  ;;  %v813_v62 = vmul.f32 %v809_v52, %v1424_v12 }
 0x1f0   : > { %v766_v37 = vpop.permute.xlu1 %765  ;;  %v786_v38 = vpop.permute.xlu0 %785 }
 0x1f1   : > { %v1556_v42 = vpop.permute.xlu2 %681  ;;  %v769_v29 = vsel %vm519_vm4, %v762_v31, %v766_v37  ;;  %v771_v30 = vsel %vm519_vm4, %v766_v37, %v762_v31 }
 0x1f2   : > { %v774_v53 = vmul.f32 %v771_v30, %v1412_v3 }
 0x1f8   : > { %v1554_v40 = vpop.permute.xlu1 %717  ;;  %v742_v41 = vpop.permute.xlu0 %741 }
 0x1f9   : > { %v784_v51 = vpop.permute.xlu2 %783 }
 0x200   : > { %v1558_v47 = vpop.permute.xlu1 %701  ;;  %v1560_v48 = vpop.permute.xlu0 %721 }
 0x201   : > { %v768_v4 = vpop.permute.xlu2 %767 }
 0x208   : > { %v1562_v49 = vpop.permute.xlu1 %657  ;;  %v1564_v50 = vpop.permute.xlu0 %677 }
 0x209   : > { %v720_v52 = vpop.permute.xlu2 %719 }
 0x210   : > { %v804_v54 = vpop.permute.xlu1 %803  ;;  %v808_v55 = vpop.permute.xlu0 %807 }
 0x211   : > { %v810_v58 = vsel %vm567_vm5, %v804_v54, %v808_v55  ;;  %v812_v59 = vsel %vm567_vm5, %v808_v55, %v804_v54  ;;  %v751_v54 = vsel %vm492_vm3, %v746_v36, %v742_v41 }
 0x212   : > { %v816_v61 = vmul.f32 %v812_v59, %v1426_v13  ;;  %v815_v63 = vmul.f32 %v810_v58, %v1424_v12  ;;  %v789_v13 = vsel %vm540_vm2, %v782_v32, %v786_v38  ;;  %v791_v12 = vsel %vm540_vm2, %v786_v38, %v782_v32 }
 0x213   : > { %v794_v18 = vmul.f32 %v791_v12, %v1384_v46  ;;  %v793_v23 = vmul.f32 %v789_v13, %v1382_v45  ;;  %v866_v13 = vpack.c.bf16 %v1507_v22, %v1473_v14  ;;  %v707_v22 = vsel %vm437_vm8, %v1558_v47, %v1552_v39 }
 0x214   : > { %v873_v5 = vpack.c.bf16 %v815_v63, %v813_v62  ;;  %v874_v6 = vpack.c.bf16 %v816_v61, %v814_v60 }
 0x216   : > { %954 = vmatpush.bf16.msra.mxu3 %v873_v5  ;;  %992 = vmatpush.bf16.msrb.mxu0 %v874_v6 }
 0x218   : > { %v788_v8 = vpop.permute.xlu1 %787  ;;  %v764_v9 = vpop.permute.xlu0 %763 }
 0x219   : > { %v790_v10 = vsel %vm540_vm2, %v784_v51, %v788_v8  ;;  %v792_v15 = vsel %vm540_vm2, %v788_v8, %v784_v51  ;;  %v770_v16 = vsel %vm519_vm4, %v764_v9, %v768_v4  ;;  %v772_v17 = vsel %vm519_vm4, %v768_v4, %v764_v9  ;;  %1206 = vmatmul.msk.bf16.vlgmr.msra.gmra.mxu3 %vm921_vm10, %v1197_v7  ;;  %v704_v4 = vpop.permute.xlu2 %703 }
 0x21a   : > { %v796_v19 = vmul.f32 %v792_v15, %v1384_v46  ;;  %v795_v26 = vmul.f32 %v790_v10, %v1382_v45  ;;  %1208 = vmatmul.msk.bf16.vlgmr.msrb.gmra.mxu0 %vm921_vm10, %v1197_v7  ;;  %v775_v32 = vmul.f32 %v770_v16, %v1410_v2  ;;  %v776_v35 = vmul.f32 %v772_v17, %v1412_v3 }
 0x21b   : > { %v773_v46 = vmul.f32 %v769_v29, %v1410_v2  ;;  %v749_v45 = vsel %vm492_vm3, %v742_v41, %v746_v36  ;;  %v754_v3 = vmul.f32 %v751_v54, %v1398_v57  ;;  %v1220_v36 = vld [vmem:[%s1758_s4 + $0x14] sm:$0xf]  ;;  %v1202_v41 = vld [vmem:[%s1758_s4 + $0x18] sm:$0xf0]  ;;  %v865_v7 = vpack.c.bf16 %v1505_v21, %v1471_v11 }
 0x21c   : > { %v871_v38 = vpack.c.bf16 %v795_v26, %v793_v23  ;;  %v872_v51 = vpack.c.bf16 %v796_v19, %v794_v18  ;;  %v870_v58 = vpack.c.bf16 %v776_v35, %v774_v53  ;;  %v753_v59 = vmul.f32 %v749_v45, %v1396_v56 }
 0x21d   : > { %v869_v55 = vpack.c.bf16 %v775_v32, %v773_v46  ;;  %v1205_v1 = vor.u32 %v1220_v36, %v1202_v41  ;;  %v705_v10 = vsel %vm437_vm8, %v1552_v39, %v1558_v47  ;;  %v709_v17 = vmul.f32 %v707_v22, %v1458_v43 }
 0x21e   : > { %928 = vmatpush.bf16.msra.mxu2 %v871_v38  ;;  %966 = vmatpush.bf16.msrb.mxu3 %v872_v51  ;;  %v687_v18 = vsel %vm410_vm0, %v1556_v42, %v1564_v50  ;;  %v710_v19 = vmul.f32 %v705_v10, %v1460_v44  ;;  %v685_v39 = vsel %vm410_vm0, %v1564_v50, %v1556_v42 }
 0x21f   : > { %v689_v29 = vmul.f32 %v687_v18, %v1354_v24  ;;  %v690_v35 = vmul.f32 %v685_v39, %v1356_v25 }
 0x220   : > { %v744_v31 = vpop.permute.xlu1 %743  ;;  %v748_v37 = vpop.permute.xlu0 %747 }
 0x221   : > { %v750_v60 = vsel %vm492_vm3, %v744_v31, %v748_v37  ;;  %v752_v2 = vsel %vm492_vm3, %v748_v37, %v744_v31 }
 0x222   : > { %v755_v61 = vmul.f32 %v750_v60, %v1396_v56  ;;  %v756_v62 = vmul.f32 %v752_v2, %v1398_v57  ;;  %929 = vmatpush.bf16.msra.mxu2 %v869_v55  ;;  %967 = vmatpush.bf16.msrb.mxu3 %v870_v58  ;;  %v727_v56 = vsel %vm458_vm1, %v1560_v48, %v1554_v40  ;;  %v1219_v60 = vld [vmem:[%s1758_s4 + $0x4] sm:$0xf0] }
 0x223   : > { %v725_v57 = vsel %vm458_vm1, %v1554_v40, %v1560_v48  ;;  %v729_v12 = vmul.f32 %v727_v56, %v1368_v33 }
 0x224   : > { %v867_v63 = vpack.c.bf16 %v755_v61, %v753_v59  ;;  %v868_v0 = vpack.c.bf16 %v756_v62, %v754_v3  ;;  %v730_v48 = vmul.f32 %v725_v57, %v1370_v34  ;;  %v1192_v59 = vld [vmem:[%s1758_s4] sm:$0xf] }
 0x225   : > { %v1193_v20 = vor.u32 %v1219_v60, %v1192_v59 }
 0x226   : > { %930 = vmatpush.bf16.msra.mxu2 %v867_v63  ;;  %968 = vmatpush.bf16.msrb.mxu3 %v868_v0 }
 0x228   : > { %v724_v5 = vpop.permute.xlu1 %723  ;;  %v700_v6 = vpop.permute.xlu0 %699 }
 0x229   : > { %v726_v8 = vsel %vm458_vm1, %v720_v52, %v724_v5  ;;  %v728_v9 = vsel %vm458_vm1, %v724_v5, %v720_v52  ;;  %v708_v40 = vsel %vm437_vm8, %v704_v4, %v700_v6  ;;  %1207 = vmatmul.msk.bf16.gmra.mxu3 %vm921_vm10, %v1205_v1  ;;  %v706_v14 = vsel %vm437_vm8, %v700_v6, %v704_v4  ;;  %v660_v52 = vpop.permute.xlu2 %659 }
 0x22a   : > { %v731_v11 = vmul.f32 %v728_v9, %v1368_v33  ;;  %v732_v21 = vmul.f32 %v726_v8, %v1370_v34  ;;  %931 = vmatpush.bf16.msra.mxu2 %v865_v7  ;;  %969 = vmatpush.bf16.msrb.mxu3 %v866_v13  ;;  %v711_v33 = vmul.f32 %v708_v40, %v1458_v43 }
 0x22b   : > { %1209 = vmatmul.msk.bf16.gmra.mxu0 %vm921_vm10, %v1205_v1  ;;  %v712_v16 = vmul.f32 %v706_v14, %v1460_v44  ;;  %v881_v44 = vld [vmem:[%s1759_s5 + $0x10] sm:$0xff] }
 0x22c   : > { %v863_v34 = vpack.c.bf16 %v731_v11, %v729_v12  ;;  %v864_v15 = vpack.c.bf16 %v732_v21, %v730_v48  ;;  %v861_v26 = vpack.c.bf16 %v711_v33, %v709_v17  ;;  %895 = vperm.xlu0 %1242, %v881_v44  }
 0x22d   : > { %v862_v32 = vpack.c.bf16 %v712_v16, %v710_v19 }
 0x22e   : > { %932 = vmatpush.bf16.msra.mxu2 %v863_v34  ;;  %970 = vmatpush.bf16.msrb.mxu3 %v864_v15 }
 0x230   : > { %v680_v47 = vpop.permute.xlu1 %679  ;;  %v684_v23 = vpop.permute.xlu0 %683 }
 0x231   : > { %v686_v43 = vsel %vm410_vm0, %v680_v47, %v684_v23  ;;  %v688_v30 = vsel %vm410_vm0, %v684_v23, %v680_v47  ;;  %v901_v57 = vpop.permute.xlu2 %900 }
 0x232   : > { %v691_v42 = vmul.f32 %v688_v30, %v1354_v24  ;;  %v692_v50 = vmul.f32 %v686_v43, %v1356_v25  ;;  %933 = vmatpush.bf16.msra.mxu2 %v861_v26  ;;  %971 = vmatpush.bf16.msrb.mxu3 %v862_v32 }
 0x234   : > { %v859_v38 = vpack.c.bf16 %v691_v42, %v689_v29  ;;  %v860_v51 = vpack.c.bf16 %v692_v50, %v690_v35 }
 0x236   : > { %934 = vmatpush.bf16.msra.mxu2 %v859_v38  ;;  %972 = vmatpush.bf16.msrb.mxu3 %v860_v51 }
 0x238   : > { %v664_v46 = vpop.permute.xlu1 %663  ;;  %v662_v53 = vpop.permute.xlu0 %661 }
 0x239   : > { %v666_v45 = vsel %vm389_vm6, %v660_v52, %v664_v46  ;;  %v668_v54 = vsel %vm389_vm6, %v664_v46, %v660_v52  ;;  %v665_v24 = vsel %vm389_vm6, %v1562_v49, %v662_v53  ;;  %v667_v25 = vsel %vm389_vm6, %v662_v53, %v1562_v49  ;;  %v886_v34 = vpop.permute.xlu2 %885 }
 0x23a   : > { %v671_v31 = vmul.f32 %v668_v54, %v1444_v27  ;;  %v672_v37 = vmul.f32 %v666_v45, %v1446_v28  ;;  %v669_v55 = vmul.f32 %v667_v25, %v1444_v27  ;;  %v670_v58 = vmul.f32 %v665_v24, %v1446_v28  ;;  %v1200_v27 = vld [vmem:[%s1758_s4 + $0x10] sm:$0xf]  ;;  %v1221_v28 = vld [vmem:[%s1758_s4 + $0x14] sm:$0xf0] }
 0x23b   : > { %v1201_v49 = vor.u32 %v1221_v28, %v1200_v27  ;;  %v1262_v45 = vmov 256.0  }
 0x23c   : > { %v857_v2 = vpack.c.bf16 %v671_v31, %v669_v55  ;;  %v858_v3 = vpack.c.bf16 %v672_v37, %v670_v58  ;;  %1243 = vrcp.f32 %v1262_v45 }
 0x23e   : > { %935 = vmatpush.bf16.msra.mxu2 %v857_v2  ;;  %973 = vmatpush.bf16.msrb.mxu3 %v858_v3 }
 0x240   : > { %v891_v4 = vpop.permute.xlu1 %890 }
 0x241   : > { %936 = vmatmul.bf16.vlgmr.msra.gmra.mxu2 %v1193_v20  ;;  %974 = vmatmul.bf16.vlgmr.msrb.gmra.mxu3 %v1193_v20 }
 0x242   : > { %v1244_v54 = vpop.eup %1243 }
 0x243   : > { %v1025_v24 = vmul.f32 256.0, %v1244_v54  ;;  %vm1029_vm11 = vweird.f32 %v1244_v54 }
 0x245   : > { %v1026_v25 = vsub.f32 1.0, %v1025_v24 }
 0x247   : > { %v1027_v31 = vmul.f32 %v1244_v54, %v1026_v25 }
 0x249   : > { %v1028_v55 = vadd.f32 %v1244_v54, %v1027_v31 }
 0x24b   : > { %v1030_v58 = vsel %vm1029_vm11, %v1244_v54, %v1028_v55 }
 0x251   : > { %941 = vmatmul.bf16.gmra.mxu2 %v1201_v49  ;;  %979 = vmatmul.bf16.gmra.mxu3 %v1201_v49  ;;  %v1035_v49 = vld [vmem:[%s1760_s6] sm:$0xff] }
 0x297   : > { %v994_v63 = vpop.f32.mrf.mxu0 }
 0x29c   : > { %v956_v61 = vpop.f32.mrf.mxu3 }
 0x29e   : > { %v896_v48 = vpop.permute.xlu0 %895 }
 0x29f   : > { %v996_v56 = vpop.f32.mrf.mxu0 }
 0x2a4   : > { %v958_v62 = vpop.f32.mrf.mxu3 }
 0x2a8   : > { %v999_v11 = vpop.f32.mrf.mxu0 }
 0x2ac   : > { %v961_v36 = vpop.f32.mrf.mxu3 }
 0x2b0   : > { %v1001_v44 = vpop.f32.mrf.mxu0 }
 0x2b4   : > { %v963_v41 = vpop.f32.mrf.mxu3 }
 0x2c4   : > { %v937_v0 = vpop.f32.mrf.mxu2  ;;  %v975_v1 = vpop.f32.mrf.mxu3 }
 0x2c5   : > { %v938_v15 = vadd.f32 %v937_v0, %v886_v34  ;;  %v976_v16 = vadd.f32 %v975_v1, %v886_v34  ;;  %v1041_v1 = vld [vmem:[%s1761_s7 + $0x10] sm:$0xff] }
 0x2c7   : > { %v957_v47 = vadd.f32 %v956_v61, %v938_v15  ;;  %v995_v23 = vadd.f32 %v994_v63, %v976_v16  ;;  %v1036_v61 = vld [vmem:[%s1760_s6 + $0x8] sm:$0xff] }
 0x2c9   : > { %v1004_v35 = vmax.f32 %v957_v47, 0.0  ;;  %v1005_v42 = vmax.f32 %v995_v23, 0.0 }
 0x2cb   : > { %v1012_v53 = vadd.f32 %v1005_v42, %v1004_v35 }
 0x2cc   : > { %v939_v5 = vpop.f32.mrf.mxu2  ;;  %v977_v6 = vpop.f32.mrf.mxu3 }
 0x2cd   : > { %v940_v7 = vadd.f32 %v939_v5, %v891_v4  ;;  %v978_v13 = vadd.f32 %v977_v6, %v891_v4 }
 0x2cf   : > { %v959_v12 = vadd.f32 %v958_v62, %v940_v7  ;;  %v997_v8 = vadd.f32 %v996_v56, %v978_v13  ;;  %v1037_v62 = vld [vmem:[%s1760_s6 + $0x10] sm:$0xff]  ;;  %v1042_v56 = vld [vmem:[%s1761_s7 + $0x18] sm:$0xff]  ;;  %v1039_v7 = vld [vmem:[%s1761_s7] sm:$0xff] }
 0x2d1   : > { %v1006_v9 = vmax.f32 %v959_v12, 0.0  ;;  %v1007_v40 = vmax.f32 %v997_v8, 0.0 }
 0x2d3   : > { %v1015_v21 = vadd.f32 %v1007_v40, %v1006_v9 }
 0x2d4   : > { %v980_v14 = vpop.f32.mrf.mxu3  ;;  %v942_v22 = vpop.f32.mrf.mxu2 }
 0x2d5   : > { %v981_v10 = vadd.f32 %v980_v14, %v896_v48  ;;  %v943_v33 = vadd.f32 %v942_v22, %v896_v48  ;;  %1016 = vadd.xlane.f32.xlu0 %v1015_v21  ;;  %v1090_v21 = vld [vmem:[%s1763_s9] sm:$0xff] }
 0x2d7   : > { %v1000_v17 = vadd.f32 %v999_v11, %v981_v10  ;;  %v962_v18 = vadd.f32 %v961_v36, %v943_v33  ;;  %v1038_v36 = vld [vmem:[%s1760_s6 + $0x18] sm:$0xff]  ;;  %v1089_v11 = vld [vmem:[%s1762_s8] sm:$0xff] }
 0x2d9   : > { %v1008_v19 = vmax.f32 %v962_v18, 0.0  ;;  %v1009_v39 = vmax.f32 %v1000_v17, 0.0 }
 0x2db   : > { %v1018_v26 = vadd.f32 %v1009_v39, %v1008_v19 }
 0x2dc   : > { %v944_v29 = vpop.f32.mrf.mxu2  ;;  %v982_v43 = vpop.f32.mrf.mxu3 }
 0x2dd   : > { %v945_v30 = vadd.f32 %v944_v29, %v901_v57  ;;  %v983_v32 = vadd.f32 %v982_v43, %v901_v57  ;;  %1019 = vadd.xlane.f32.xlu2 %v1018_v26  ;;  %v1040_v57 = vld [vmem:[%s1761_s7 + $0x8] sm:$0xff] }
 0x2df   : > { %v964_v50 = vadd.f32 %v963_v41, %v945_v30  ;;  %v1002_v38 = vadd.f32 %v1001_v44, %v983_v32 }
 0x2e1   : > { %v1010_v51 = vmax.f32 %v964_v50, 0.0  ;;  %v1011_v52 = vmax.f32 %v1002_v38, 0.0 }
 0x2e3   : > { %v1021_v46 = vadd.f32 %v1011_v52, %v1010_v51 }
 0x2e5   : > { %1022 = vadd.xlane.f32.xlu1 %v1021_v46  ;;  %1013 = vadd.xlane.f32.xlu2 %v1012_v53 }
 0x348   : > { %v1017_v2 = vpop.xlane.xlu0 %1016 }
 0x349   : > { %v1032_v27 = vmul.f32 %v1030_v58, %v1017_v2 }
 0x350   : > { %v1020_v37 = vpop.xlane.xlu2 %1019 }
 0x351   : > { %v1033_v3 = vmul.f32 %v1030_v58, %v1020_v37 }
 0x358   : > { %v1023_v59 = vpop.xlane.xlu1 %1022  ;;  %v1014_v20 = vpop.xlane.xlu2 %1013 }
 0x359   : > { %v1034_v60 = vmul.f32 %v1030_v58, %v1023_v59  ;;  %v1031_v28 = vmul.f32 %v1030_v58, %v1014_v20 }
 0x35b   : > { %1068 = vmatpush.msrb.mxu1 %v1034_v60 }
 0x35d   : > { %1069 = vmatpush.msrb.mxu1 %v1033_v3 }
 0x35f   : > { %1070 = vmatpush.msrb.mxu1 %v1032_v27 }
 0x361   : > { %1071 = vmatpush.msrb.mxu1 %v1031_v28 }
 0x362   : > { %1210 = vmatmul.msk.f32.vlgmr.msrb.gmra.mxu1 %vm1043_vm12, %v1035_v49 }
 0x36a   : > { %1211 = vmatmul.msk.f32.gmra.mxu1 %vm1043_vm12, %v1036_v61 }
 0x372   : > { %1212 = vmatmul.msk.f32.gmra.mxu1 %vm1043_vm12, %v1037_v62 }
 0x37a   : > { %1213 = vmatmul.msk.f32.gmra.mxu1 %vm1043_vm12, %v1038_v36 }
 0x3df   : > { %v1073_v41 = vpop.f32.mrf.mxu1 }
 0x3e0   : > { %v1074_v8 = vadd.f32 %v1073_v41, %v1039_v7 }
 0x3e2   : > { %v1085_v48 = vmax.f32 %v1074_v8, 0.0 }
 0x3e7   : > { %v1076_v63 = vpop.f32.mrf.mxu1 }
 0x3e8   : > { %v1077_v13 = vadd.f32 %v1076_v63, %v1040_v57 }
 0x3ea   : > { %v1086_v40 = vmax.f32 %v1077_v13, 0.0 }
 0x3ef   : > { %v1079_v0 = vpop.f32.mrf.mxu1 }
 0x3f0   : > { %v1080_v5 = vadd.f32 %v1079_v0, %v1041_v1 }
 0x3f2   : > { %v1087_v9 = vmax.f32 %v1080_v5, 0.0 }
 0x3f7   : > { %v1082_v4 = vpop.f32.mrf.mxu1 }
 0x3f8   : > { %v1083_v6 = vadd.f32 %v1082_v4, %v1042_v56 }
 0x3fa   : > { %v1088_v12 = vmax.f32 %v1083_v6, 0.0 }
 0x3fc   : > { %1106 = vmatpush.msra.mxu0 %v1088_v12 }
 0x3fe   : > { %1107 = vmatpush.msra.mxu0 %v1087_v9 }
 0x400   : > { %1108 = vmatpush.msra.mxu0 %v1086_v40 }
 0x402   : > { %1109 = vmatpush.msra.mxu0 %v1085_v48 }
 0x403   : > { %1214 = vmatmul.msk.f32.vlgmr.msra.gmra.mxu0 %vm1043_vm12, %v1089_v11 }
 0x480   : > { %v1111_v14 = vpop.f32.mrf.mxu0 }
 0x481   : > { %v1112_v22 = vadd.f32 %v1111_v14, %v1090_v21 }
 0x483   : > { %1115 = vst.msk [vmem:[%s359_s15] sm:$0xff] %vm1114_vm13, %v1112_v22 }
 0x484 PF: > { %s20_s13 = sadd.s32 1, %s1251_s13  }
 0x485   : > { %p17_p5 = scmp.ge.s32.totalorder %s20_s13, 4  }
 0x487   :  { %19 = sbr.rel (!%p17_p5) target bundleno = 1 (0x1), region = 97 }

</bundles_post_ra>
